<compile_context>
chip_gen: v7x
topology: tpu7x:2x2x1
jax: 0.10.0
libtpu: 0.0.40
codegen_flags: <defaults>
</compile_context>

<pallas_src>
import functools

import jax
import jax.numpy as jnp
import numpy as np
from jax.experimental import pallas as pl
from jax.experimental.pallas import tpu as pltpu


def _round_up(x, m):
    return ((x + m - 1) // m) * m


def _vmem_capacity_bytes():
    """Per-core VMEM capacity; conservative fallback = v7x's 64 MiB."""
    try:
        info = pltpu.get_tpu_info()
        for name in ("vmem_capacity_bytes", "vmem_bytes", "vmem_size_bytes"):
            val = getattr(info, name, None)
            if val:
                return int(val)
    except Exception:
        pass
    return 64 * 2**20


# ----------------------------- fused Pallas kernel ---------------------------

def _make_encoder_kernel(bt, wI, LY1, L2S):
    """conv1 + ReLU + conv2 + ReLU for `bt` images per grid step.

    Refs (all blocks; compute dtype unless noted):
      x_ref    : (bt, 16*C, LI_pad)  phase-decomposed padded image slabs
      w1g_ref  : (4, 4*C1, 16*C)     conv1 weights grouped by lane shift (dr,dc)
      b1_ref   : (4*C1, 1)  f32      conv1 bias tiled over the 4 phases
      mask_ref : (1, LY1)   f32      1 on valid conv1-output lanes, 0 on pad ring
      w2g_ref  : (9, C2, 4*C1)       conv2 weights grouped by lane shift (da,db)
      b2_ref   : (C2, 1)    f32
      o_ref    : (bt, C2, L2S) f32   conv2 output (lane-padded flat layout)
    """
    c1_starts = tuple(dr * wI + dc for dr in (0, 1) for dc in (0, 1))
    c2_starts = tuple((da + 1) * wI + (db + 1)
                      for da in (-1, 0, 1) for db in (-1, 0, 1))

    def kernel(x_ref, w1g_ref, b1_ref, mask_ref, w2g_ref, b2_ref, o_ref):
        w1g = w1g_ref[...]
        w2g = w2g_ref[...]
        b1 = b1_ref[...]
        b2 = b2_ref[...]
        mask = mask_ref[...]

        def body(ib, carry):
            xi = x_ref[ib]                                   # (16*C, LI_pad)

            # ---- conv1: 4 grouped shift-matmuls, f32 accumulation ----------
            s = c1_starts[0]
            acc1 = jnp.dot(w1g[0], xi[:, s:s + LY1],
                           preferred_element_type=jnp.float32)
            for g in range(1, 4):
                s = c1_starts[g]
                acc1 = acc1 + jnp.dot(w1g[g], xi[:, s:s + LY1],
                                      preferred_element_type=jnp.float32)
            # bias + ReLU + border mask (mask keeps conv2's zero padding exact)
            y1 = (jnp.maximum(acc1 + b1, 0.0) * mask).astype(xi.dtype)

            # ---- conv2: 9 grouped shift-matmuls over the resident y1 -------
            s = c2_starts[0]
            acc2 = jnp.dot(w2g[0], y1[:, s:s + L2S],
                           preferred_element_type=jnp.float32)
            for t in range(1, 9):
                s = c2_starts[t]
                acc2 = acc2 + jnp.dot(w2g[t], y1[:, s:s + L2S],
                                      preferred_element_type=jnp.float32)

            o_ref[ib] = jnp.maximum(acc2 + b2, 0.0)          # full-width store
            return carry

        jax.lax.fori_loop(0, bt, body, 0)

    return kernel


# ----------------------------- wrapper ---------------------------------------

def _pick_batch_block(B, requested, per_image_bytes, vmem_cap):
    bt = max(1, int(requested))
    if B >= 16:
        bt = min(bt, B // 8)      # >= 8 grid steps -> >=4 per TC on 2-TC chips
    elif B >= 2:
        bt = min(bt, B // 2)      # at least 2 grid steps
    else:
        bt = 1
    bt = max(bt, 1)
    while bt > 1 and 6 * bt * per_image_bytes > vmem_cap // 2:
        bt //= 2
    return bt


@functools.partial(jax.jit, static_argnames=("compute_dtype", "batch_block"))
def observation_encoder(obs, params, compute_dtype=jnp.bfloat16, batch_block=4):
    """Mirrors ObservationEncoder.forward (kernel=4, stride=2, padding=1)."""
    w1, b1, w2, b2 = params["w1"], params["b1"], params["w2"], params["b2"]
    C1, C_in, k, _ = w1.shape
    C2 = w2.shape[0]
    assert k == 4 and w2.shape[2] == 4, "kernel specialized to 4x4 convolutions"

    batch_shape = obs.shape[:-3]
    C, H, W = obs.shape[-3:]
    assert C == C_in
    assert H % 4 == 0 and W % 4 == 0, "spatial dims must be divisible by 4"
    x = obs.reshape((-1, C, H, W))
    B = x.shape[0]

    # conv1: (H,W) -> (H/2,W/2); conv2: -> (H/4,W/4)
    H2, W2 = H // 4, W // 4
    wI = W2 + 3                              # flat row width of a phase slab
    L2n = (H2 - 1) * wI + W2                 # valid conv2-output flat extent
    L2S = _round_up(L2n, 128)                # lane-padded per-image output slab
    LY1 = 2 * wI + 2 + L2S                   # conv1 activation window length
    LI = (H2 + 3) * wI                       # semantic phase-slab length
    LI_pad = _round_up(max(LI, wI + 1 + LY1), 128)   # lane-padded input slab

    cdt = jnp.dtype(compute_dtype)
    itemsize = cdt.itemsize
    vmem_cap = _vmem_capacity_bytes()
    per_image_bytes = 16 * C_in * LI_pad * itemsize + C2 * L2S * 4
    bt = _pick_batch_block(B, batch_block, per_image_bytes, vmem_cap)
    B_pad = _round_up(B, bt)
    nb = B_pad // bt

    # --- phase-decomposed, zero-padded, flattened input (no im2col) ----------
    xb = jnp.pad(x, ((0, B_pad - B), (0, 0), (5, 7), (5, 7)))
    phases = [xb[:, :, pr::4, pc::4] for pr in range(4) for pc in range(4)]
    xhat = jnp.stack(phases, axis=1).reshape(B_pad, 16 * C_in, LI)
    xhat = jnp.pad(xhat, ((0, 0), (0, 0), (0, LI_pad - LI))).astype(cdt)

    # --- conv1 weights grouped by lane shift (dr, dc) -------------------------
    w1g = jnp.zeros((4, 4 * C1, 16 * C_in), cdt)
    for qy in range(2):
        for qx in range(2):
            q = 2 * qy + qx
            for kh in range(4):
                pr, dr = (2 * qy + kh) % 4, (2 * qy + kh) // 4
                for kw in range(4):
                    pc, dc = (2 * qx + kw) % 4, (2 * qx + kw) // 4
                    w1g = w1g.at[2 * dr + dc,
                                 q * C1:(q + 1) * C1,
                                 (4 * pr + pc) * C_in:(4 * pr + pc + 1) * C_in
                                 ].set(w1[:, :, kh, kw].astype(cdt))

    # --- conv2 weights grouped by lane shift (da, db) --------------------------
    w2g = jnp.zeros((9, C2, 4 * C1), cdt)
    for kh in range(4):
        qy, da = (kh + 1) % 2, (kh - 1) // 2
        for kw in range(4):
            qx, db = (kw + 1) % 2, (kw - 1) // 2
            q = 2 * qy + qx
            w2g = w2g.at[3 * (da + 1) + (db + 1), :,
                         q * C1:(q + 1) * C1].set(w2[:, :, kh, kw].astype(cdt))

    b1t = jnp.tile(b1.astype(jnp.float32), 4).reshape(4 * C1, 1)
    b2c = b2.astype(jnp.float32).reshape(C2, 1)

    # valid conv1-output lanes: rows/cols 1..H2 / 1..W2 of the padded slab
    f = np.arange(LY1)
    mrow, mcol = f // wI, f % wI
    mask = jnp.asarray(((mrow >= 1) & (mrow <= H2) & (mcol >= 1) & (mcol <= W2))
                       .astype(np.float32).reshape(1, LY1))

    # --- VMEM budget: clamp to ~75% of the chip's VMEM (v7x: 64 MiB/TC) -------
    in_block = bt * 16 * C_in * LI_pad * itemsize
    out_block = bt * C2 * L2S * 4
    need = 4 * (in_block + out_block) + (24 << 20)
    vmem_limit = int(min(max(need, 32 << 20), int(0.75 * vmem_cap)))

    kernel = _make_encoder_kernel(bt, wI, LY1, L2S)
    out = pl.pallas_call(
        kernel,
        out_shape=jax.ShapeDtypeStruct((B_pad, C2, L2S), jnp.float32),
        grid=(nb,),
        in_specs=[
            pl.BlockSpec((bt, 16 * C_in, LI_pad), lambda i: (i, 0, 0)),  # images
            pl.BlockSpec((4, 4 * C1, 16 * C_in), lambda i: (0, 0, 0)),   # w1 grouped
            pl.BlockSpec((4 * C1, 1), lambda i: (0, 0)),                 # b1 tiled
            pl.BlockSpec((1, LY1), lambda i: (0, 0)),                    # mask
            pl.BlockSpec((9, C2, 4 * C1), lambda i: (0, 0, 0)),          # w2 grouped
            pl.BlockSpec((C2, 1), lambda i: (0, 0)),                     # b2
        ],
        out_specs=pl.BlockSpec((bt, C2, L2S), lambda i: (i, 0, 0)),
        compiler_params=pltpu.CompilerParams(
            dimension_semantics=("parallel",),
            vmem_limit_bytes=vmem_limit),
    )(xhat, w1g, b1t, mask, w2g, b2c)

    # --- strip batch/lane padding, unpack flat layout -> NCHW -> flatten ------
    out = out[:B, :, :L2n]
    out = jnp.pad(out, ((0, 0), (0, 0), (0, H2 * wI - L2n)))
    out = out.reshape(B, C2, H2, wI)[..., :W2]                # (B, C2, H2, W2)
    return out.reshape(batch_shape + (C2 * H2 * W2,))


# ----------------------------- reference (pure JAX) ---------------------------

def _reference(obs, params, stride=2, padding=1):
    def conv(x, w, b):
        y = jax.lax.conv_general_dilated(
            x, w, (stride, stride), ((padding, padding), (padding, padding)),
            dimension_numbers=("NCHW", "OIHW", "NCHW"))
        return jnp.maximum(y + b[None, :, None, None], 0.0)
    batch_shape = obs.shape[:-3]
    x = obs.reshape((-1,) + obs.shape[-3:])
    x = conv(x, params["w1"], params["b1"])
    x = conv(x, params["w2"], params["b2"])
    return x.reshape(batch_shape + (-1,))


# ----------------------------- main -------------------------------------------

if __name__ == "__main__":
    depth = 2                      # ObservationEncoder(depth=2)
    in_ch, spatial = 3, 16         # shape=(3, 16, 16) -- small spatial for test
    batch = 2

    key = jax.random.PRNGKey(0)
    k_obs, k_w1, k_b1, k_w2, k_b2, k_obs2 = jax.random.split(key, 6)

    obs = jax.random.normal(k_obs, (batch, in_ch, spatial, spatial),
                            dtype=jnp.float32)

    # Deterministic parameter init (shapes from nn.Conv2d in __init__).
    params = {
        "w1": 0.1 * jax.random.normal(k_w1, (1 * depth, in_ch, 4, 4), jnp.float32),
        "b1": 0.1 * jax.random.normal(k_b1, (1 * depth,), jnp.float32),
        "w2": 0.1 * jax.random.normal(k_w2, (2 * depth, 1 * depth, 4, 4), jnp.float32),
        "b2": 0.1 * jax.random.normal(k_b2, (2 * depth,), jnp.float32),
    }

    ref = jax.block_until_ready(_reference(obs, params))

    # Default path: bf16 compute, f32 accumulation (looser tolerance by design).
    embed = jax.block_until_ready(observation_encoder(obs, params))
    assert embed.shape == (batch, 2 * depth * 4 * 4), embed.shape
    assert jnp.allclose(embed, ref, rtol=5e-2, atol=5e-2), \
        float(jnp.max(jnp.abs(embed - ref)))

    # f32 compute path: tight check.
    embed_f32 = jax.block_until_ready(
        observation_encoder(obs, params, compute_dtype=jnp.float32))
    assert jnp.allclose(embed_f32, ref, rtol=1e-4, atol=1e-4), \
        float(jnp.max(jnp.abs(embed_f32 - ref)))

    # Odd batch: exercises batch padding (B_pad) and multi-image blocks (bt=2).
    obs2 = jax.random.normal(k_obs2, (5, in_ch, spatial, spatial), jnp.float32)
    ref2 = jax.block_until_ready(_reference(obs2, params))
    emb2 = jax.block_until_ready(
        observation_encoder(obs2, params, compute_dtype=jnp.float32))
    assert emb2.shape == (5, 2 * depth * 4 * 4), emb2.shape
    assert jnp.allclose(emb2, ref2, rtol=1e-4, atol=1e-4), \
        float(jnp.max(jnp.abs(emb2 - ref2)))

    print("KERNEL_OK")
</pallas_src>

<mosaic_0001>
module attributes {stable_mosaic.version = 11 : i64} {
  func.func @kernel(%arg0: i32, %arg1: memref<1x48x256xbf16, #tpu.memory_space<vmem>>, %arg2: memref<4x8x48xbf16, #tpu.memory_space<vmem>>, %arg3: memref<8x1xf32, #tpu.memory_space<vmem>>, %arg4: memref<1x144xf32, #tpu.memory_space<vmem>>, %arg5: memref<9x4x8xbf16, #tpu.memory_space<vmem>>, %arg6: memref<4x1xf32, #tpu.memory_space<vmem>>, %arg7: memref<1x4x128xf32, #tpu.memory_space<vmem>>) attributes {dimension_semantics = [#tpu.dimension_semantics<parallel>], iteration_bounds = array<i64: 2>, scalar_prefetch = 0 : i64, scratch_operands = 0 : i64, tpu.core_type = #tpu.core_type<tc>, window_params = [{transform_indices = @transform_0, window_bounds = array<i64: 1, 48, 256>}, {pipeline_mode = #tpu.pipeline_mode<synchronous>, transform_indices = @transform_1, window_bounds = array<i64: 4, 8, 48>}, {pipeline_mode = #tpu.pipeline_mode<synchronous>, transform_indices = @transform_2, window_bounds = array<i64: 8, 1>}, {pipeline_mode = #tpu.pipeline_mode<synchronous>, transform_indices = @transform_3, window_bounds = array<i64: 1, 144>}, {pipeline_mode = #tpu.pipeline_mode<synchronous>, transform_indices = @transform_4, window_bounds = array<i64: 9, 4, 8>}, {pipeline_mode = #tpu.pipeline_mode<synchronous>, transform_indices = @transform_5, window_bounds = array<i64: 4, 1>}, {transform_indices = @transform_6, window_bounds = array<i64: 1, 4, 128>}]} {
    %c0 = arith.constant 0 : index
    %c0_0 = arith.constant 0 : index
    %c0_1 = arith.constant 0 : index
    %0 = vector.load %arg2[%c0, %c0_0, %c0_1] : memref<4x8x48xbf16, #tpu.memory_space<vmem>>, vector<4x8x48xbf16>
    %c0_2 = arith.constant 0 : index
    %c0_3 = arith.constant 0 : index
    %c0_4 = arith.constant 0 : index
    %1 = vector.load %arg5[%c0_2, %c0_3, %c0_4] : memref<9x4x8xbf16, #tpu.memory_space<vmem>>, vector<9x4x8xbf16>
    %c0_5 = arith.constant 0 : index
    %c0_6 = arith.constant 0 : index
    %2 = vector.load %arg3[%c0_5, %c0_6] : memref<8x1xf32, #tpu.memory_space<vmem>>, vector<8x1xf32>
    %c0_7 = arith.constant 0 : index
    %c0_8 = arith.constant 0 : index
    %3 = vector.load %arg6[%c0_7, %c0_8] : memref<4x1xf32, #tpu.memory_space<vmem>>, vector<4x1xf32>
    %c0_9 = arith.constant 0 : index
    %c0_10 = arith.constant 0 : index
    %4 = vector.load %arg4[%c0_9, %c0_10] : memref<1x144xf32, #tpu.memory_space<vmem>>, vector<1x144xf32>
    %c0_i32 = arith.constant 0 : i32
    %5 = arith.index_cast %c0_i32 : i32 to index
    %c0_11 = arith.constant 0 : index
    %c0_12 = arith.constant 0 : index
    %6 = vector.load %arg1[%5, %c0_11, %c0_12] : memref<1x48x256xbf16, #tpu.memory_space<vmem>>, vector<1x48x256xbf16>
    %7 = vector.shape_cast %6 : vector<1x48x256xbf16> to vector<48x256xbf16>
    %8 = vector.extract_strided_slice %0 {offsets = [0, 0, 0], sizes = [1, 8, 48], strides = [1, 1, 1]} : vector<4x8x48xbf16> to vector<1x8x48xbf16>
    %9 = vector.shape_cast %8 : vector<1x8x48xbf16> to vector<8x48xbf16>
    %10 = vector.extract_strided_slice %7 {offsets = [0, 0], sizes = [48, 144], strides = [1, 1]} : vector<48x256xbf16> to vector<48x144xbf16>
    %cst = arith.constant dense<0.000000e+00> : vector<8x144xf32>
    %11 = tpu.matmul %9, %10, %cst {dimension_numbers = #tpu.dot_dimension_numbers<[1], [0], [0], [1], [0, 0, 1, 1], [], []>} : vector<8x48xbf16>, vector<48x144xbf16>, vector<8x144xf32> -> vector<8x144xf32>
    %12 = vector.extract_strided_slice %0 {offsets = [1, 0, 0], sizes = [1, 8, 48], strides = [1, 1, 1]} : vector<4x8x48xbf16> to vector<1x8x48xbf16>
    %13 = vector.shape_cast %12 : vector<1x8x48xbf16> to vector<8x48xbf16>
    %14 = vector.extract_strided_slice %7 {offsets = [0, 1], sizes = [48, 144], strides = [1, 1]} : vector<48x256xbf16> to vector<48x144xbf16>
    %cst_13 = arith.constant dense<0.000000e+00> : vector<8x144xf32>
    %15 = tpu.matmul %13, %14, %cst_13 {dimension_numbers = #tpu.dot_dimension_numbers<[1], [0], [0], [1], [0, 0, 1, 1], [], []>} : vector<8x48xbf16>, vector<48x144xbf16>, vector<8x144xf32> -> vector<8x144xf32>
    %16 = arith.addf %11, %15 : vector<8x144xf32>
    %17 = vector.extract_strided_slice %0 {offsets = [2, 0, 0], sizes = [1, 8, 48], strides = [1, 1, 1]} : vector<4x8x48xbf16> to vector<1x8x48xbf16>
    %18 = vector.shape_cast %17 : vector<1x8x48xbf16> to vector<8x48xbf16>
    %19 = vector.extract_strided_slice %7 {offsets = [0, 7], sizes = [48, 144], strides = [1, 1]} : vector<48x256xbf16> to vector<48x144xbf16>
    %cst_14 = arith.constant dense<0.000000e+00> : vector<8x144xf32>
    %20 = tpu.matmul %18, %19, %cst_14 {dimension_numbers = #tpu.dot_dimension_numbers<[1], [0], [0], [1], [0, 0, 1, 1], [], []>} : vector<8x48xbf16>, vector<48x144xbf16>, vector<8x144xf32> -> vector<8x144xf32>
    %21 = arith.addf %16, %20 : vector<8x144xf32>
    %22 = vector.extract_strided_slice %0 {offsets = [3, 0, 0], sizes = [1, 8, 48], strides = [1, 1, 1]} : vector<4x8x48xbf16> to vector<1x8x48xbf16>
    %23 = vector.shape_cast %22 : vector<1x8x48xbf16> to vector<8x48xbf16>
    %24 = vector.extract_strided_slice %7 {offsets = [0, 8], sizes = [48, 144], strides = [1, 1]} : vector<48x256xbf16> to vector<48x144xbf16>
    %cst_15 = arith.constant dense<0.000000e+00> : vector<8x144xf32>
    %25 = tpu.matmul %23, %24, %cst_15 {dimension_numbers = #tpu.dot_dimension_numbers<[1], [0], [0], [1], [0, 0, 1, 1], [], []>} : vector<8x48xbf16>, vector<48x144xbf16>, vector<8x144xf32> -> vector<8x144xf32>
    %26 = arith.addf %21, %25 : vector<8x144xf32>
    %27 = vector.broadcast %2 : vector<8x1xf32> to vector<8x144xf32>
    %28 = arith.addf %26, %27 : vector<8x144xf32>
    %cst_16 = arith.constant 0.000000e+00 : f32
    %29 = vector.broadcast %cst_16 : f32 to vector<8x144xf32>
    %30 = arith.maximumf %28, %29 : vector<8x144xf32>
    %31 = vector.broadcast %4 : vector<1x144xf32> to vector<8x144xf32>
    %32 = arith.mulf %30, %31 : vector<8x144xf32>
    %33 = arith.truncf %32 : vector<8x144xf32> to vector<8x144xbf16>
    %34 = vector.extract_strided_slice %1 {offsets = [0, 0, 0], sizes = [1, 4, 8], strides = [1, 1, 1]} : vector<9x4x8xbf16> to vector<1x4x8xbf16>
    %35 = vector.shape_cast %34 : vector<1x4x8xbf16> to vector<4x8xbf16>
    %36 = vector.extract_strided_slice %33 {offsets = [0, 0], sizes = [8, 128], strides = [1, 1]} : vector<8x144xbf16> to vector<8x128xbf16>
    %cst_17 = arith.constant dense<0.000000e+00> : vector<4x128xf32>
    %37 = tpu.matmul %35, %36, %cst_17 {dimension_numbers = #tpu.dot_dimension_numbers<[1], [0], [0], [1], [0, 0, 1, 1], [], []>} : vector<4x8xbf16>, vector<8x128xbf16>, vector<4x128xf32> -> vector<4x128xf32>
    %38 = vector.extract_strided_slice %1 {offsets = [1, 0, 0], sizes = [1, 4, 8], strides = [1, 1, 1]} : vector<9x4x8xbf16> to vector<1x4x8xbf16>
    %39 = vector.shape_cast %38 : vector<1x4x8xbf16> to vector<4x8xbf16>
    %40 = vector.extract_strided_slice %33 {offsets = [0, 1], sizes = [8, 128], strides = [1, 1]} : vector<8x144xbf16> to vector<8x128xbf16>
    %cst_18 = arith.constant dense<0.000000e+00> : vector<4x128xf32>
    %41 = tpu.matmul %39, %40, %cst_18 {dimension_numbers = #tpu.dot_dimension_numbers<[1], [0], [0], [1], [0, 0, 1, 1], [], []>} : vector<4x8xbf16>, vector<8x128xbf16>, vector<4x128xf32> -> vector<4x128xf32>
    %42 = arith.addf %37, %41 : vector<4x128xf32>
    %43 = vector.extract_strided_slice %1 {offsets = [2, 0, 0], sizes = [1, 4, 8], strides = [1, 1, 1]} : vector<9x4x8xbf16> to vector<1x4x8xbf16>
    %44 = vector.shape_cast %43 : vector<1x4x8xbf16> to vector<4x8xbf16>
    %45 = vector.extract_strided_slice %33 {offsets = [0, 2], sizes = [8, 128], strides = [1, 1]} : vector<8x144xbf16> to vector<8x128xbf16>
    %cst_19 = arith.constant dense<0.000000e+00> : vector<4x128xf32>
    %46 = tpu.matmul %44, %45, %cst_19 {dimension_numbers = #tpu.dot_dimension_numbers<[1], [0], [0], [1], [0, 0, 1, 1], [], []>} : vector<4x8xbf16>, vector<8x128xbf16>, vector<4x128xf32> -> vector<4x128xf32>
    %47 = arith.addf %42, %46 : vector<4x128xf32>
    %48 = vector.extract_strided_slice %1 {offsets = [3, 0, 0], sizes = [1, 4, 8], strides = [1, 1, 1]} : vector<9x4x8xbf16> to vector<1x4x8xbf16>
    %49 = vector.shape_cast %48 : vector<1x4x8xbf16> to vector<4x8xbf16>
    %50 = vector.extract_strided_slice %33 {offsets = [0, 7], sizes = [8, 128], strides = [1, 1]} : vector<8x144xbf16> to vector<8x128xbf16>
    %cst_20 = arith.constant dense<0.000000e+00> : vector<4x128xf32>
    %51 = tpu.matmul %49, %50, %cst_20 {dimension_numbers = #tpu.dot_dimension_numbers<[1], [0], [0], [1], [0, 0, 1, 1], [], []>} : vector<4x8xbf16>, vector<8x128xbf16>, vector<4x128xf32> -> vector<4x128xf32>
    %52 = arith.addf %47, %51 : vector<4x128xf32>
    %53 = vector.extract_strided_slice %1 {offsets = [4, 0, 0], sizes = [1, 4, 8], strides = [1, 1, 1]} : vector<9x4x8xbf16> to vector<1x4x8xbf16>
    %54 = vector.shape_cast %53 : vector<1x4x8xbf16> to vector<4x8xbf16>
    %55 = vector.extract_strided_slice %33 {offsets = [0, 8], sizes = [8, 128], strides = [1, 1]} : vector<8x144xbf16> to vector<8x128xbf16>
    %cst_21 = arith.constant dense<0.000000e+00> : vector<4x128xf32>
    %56 = tpu.matmul %54, %55, %cst_21 {dimension_numbers = #tpu.dot_dimension_numbers<[1], [0], [0], [1], [0, 0, 1, 1], [], []>} : vector<4x8xbf16>, vector<8x128xbf16>, vector<4x128xf32> -> vector<4x128xf32>
    %57 = arith.addf %52, %56 : vector<4x128xf32>
    %58 = vector.extract_strided_slice %1 {offsets = [5, 0, 0], sizes = [1, 4, 8], strides = [1, 1, 1]} : vector<9x4x8xbf16> to vector<1x4x8xbf16>
    %59 = vector.shape_cast %58 : vector<1x4x8xbf16> to vector<4x8xbf16>
    %60 = vector.extract_strided_slice %33 {offsets = [0, 9], sizes = [8, 128], strides = [1, 1]} : vector<8x144xbf16> to vector<8x128xbf16>
    %cst_22 = arith.constant dense<0.000000e+00> : vector<4x128xf32>
    %61 = tpu.matmul %59, %60, %cst_22 {dimension_numbers = #tpu.dot_dimension_numbers<[1], [0], [0], [1], [0, 0, 1, 1], [], []>} : vector<4x8xbf16>, vector<8x128xbf16>, vector<4x128xf32> -> vector<4x128xf32>
    %62 = arith.addf %57, %61 : vector<4x128xf32>
    %63 = vector.extract_strided_slice %1 {offsets = [6, 0, 0], sizes = [1, 4, 8], strides = [1, 1, 1]} : vector<9x4x8xbf16> to vector<1x4x8xbf16>
    %64 = vector.shape_cast %63 : vector<1x4x8xbf16> to vector<4x8xbf16>
    %65 = vector.extract_strided_slice %33 {offsets = [0, 14], sizes = [8, 128], strides = [1, 1]} : vector<8x144xbf16> to vector<8x128xbf16>
    %cst_23 = arith.constant dense<0.000000e+00> : vector<4x128xf32>
    %66 = tpu.matmul %64, %65, %cst_23 {dimension_numbers = #tpu.dot_dimension_numbers<[1], [0], [0], [1], [0, 0, 1, 1], [], []>} : vector<4x8xbf16>, vector<8x128xbf16>, vector<4x128xf32> -> vector<4x128xf32>
    %67 = arith.addf %62, %66 : vector<4x128xf32>
    %68 = vector.extract_strided_slice %1 {offsets = [7, 0, 0], sizes = [1, 4, 8], strides = [1, 1, 1]} : vector<9x4x8xbf16> to vector<1x4x8xbf16>
    %69 = vector.shape_cast %68 : vector<1x4x8xbf16> to vector<4x8xbf16>
    %70 = vector.extract_strided_slice %33 {offsets = [0, 15], sizes = [8, 128], strides = [1, 1]} : vector<8x144xbf16> to vector<8x128xbf16>
    %cst_24 = arith.constant dense<0.000000e+00> : vector<4x128xf32>
    %71 = tpu.matmul %69, %70, %cst_24 {dimension_numbers = #tpu.dot_dimension_numbers<[1], [0], [0], [1], [0, 0, 1, 1], [], []>} : vector<4x8xbf16>, vector<8x128xbf16>, vector<4x128xf32> -> vector<4x128xf32>
    %72 = arith.addf %67, %71 : vector<4x128xf32>
    %73 = vector.extract_strided_slice %1 {offsets = [8, 0, 0], sizes = [1, 4, 8], strides = [1, 1, 1]} : vector<9x4x8xbf16> to vector<1x4x8xbf16>
    %74 = vector.shape_cast %73 : vector<1x4x8xbf16> to vector<4x8xbf16>
    %75 = vector.extract_strided_slice %33 {offsets = [0, 16], sizes = [8, 128], strides = [1, 1]} : vector<8x144xbf16> to vector<8x128xbf16>
    %cst_25 = arith.constant dense<0.000000e+00> : vector<4x128xf32>
    %76 = tpu.matmul %74, %75, %cst_25 {dimension_numbers = #tpu.dot_dimension_numbers<[1], [0], [0], [1], [0, 0, 1, 1], [], []>} : vector<4x8xbf16>, vector<8x128xbf16>, vector<4x128xf32> -> vector<4x128xf32>
    %77 = arith.addf %72, %76 : vector<4x128xf32>
    %78 = vector.broadcast %3 : vector<4x1xf32> to vector<4x128xf32>
    %79 = arith.addf %77, %78 : vector<4x128xf32>
    %cst_26 = arith.constant 0.000000e+00 : f32
    %80 = vector.broadcast %cst_26 : f32 to vector<4x128xf32>
    %81 = arith.maximumf %79, %80 : vector<4x128xf32>
    %82 = arith.index_cast %c0_i32 : i32 to index
    %c0_27 = arith.constant 0 : index
    %c0_28 = arith.constant 0 : index
    %83 = vector.load %arg7[%82, %c0_27, %c0_28] : memref<1x4x128xf32, #tpu.memory_space<vmem>>, vector<1x4x128xf32>
    %84 = vector.shape_cast %83 : vector<1x4x128xf32> to vector<4x128xf32>
    %85 = vector.shape_cast %81 : vector<4x128xf32> to vector<1x4x128xf32>
    tpu.vector_store %arg7[%82, %c0_27, %c0_28], %85 {strides = array<i32>} : memref<1x4x128xf32, #tpu.memory_space<vmem>>, vector<1x4x128xf32>,
    %c1_i32 = arith.constant 1 : i32
    return
  }
  func.func @transform_0(%arg0: i32) -> (i32, i32, i32) {
    %c0_i32 = arith.constant 0 : i32
    %c0_i32_0 = arith.constant 0 : i32
    %c0_i32_1 = arith.constant 0 : i32
    return %arg0, %c0_i32, %c0_i32_0 : i32, i32, i32
  }
  func.func @transform_1(%arg0: i32) -> (i32, i32, i32) {
    %c0_i32 = arith.constant 0 : i32
    %c0_i32_0 = arith.constant 0 : i32
    %c0_i32_1 = arith.constant 0 : i32
    %c0_i32_2 = arith.constant 0 : i32
    return %c0_i32, %c0_i32_0, %c0_i32_1 : i32, i32, i32
  }
  func.func @transform_2(%arg0: i32) -> (i32, i32) {
    %c0_i32 = arith.constant 0 : i32
    %c0_i32_0 = arith.constant 0 : i32
    %c0_i32_1 = arith.constant 0 : i32
    return %c0_i32, %c0_i32_0 : i32, i32
  }
  func.func @transform_3(%arg0: i32) -> (i32, i32) {
    %c0_i32 = arith.constant 0 : i32
    %c0_i32_0 = arith.constant 0 : i32
    %c0_i32_1 = arith.constant 0 : i32
    return %c0_i32, %c0_i32_0 : i32, i32
  }
  func.func @transform_4(%arg0: i32) -> (i32, i32, i32) {
    %c0_i32 = arith.constant 0 : i32
    %c0_i32_0 = arith.constant 0 : i32
    %c0_i32_1 = arith.constant 0 : i32
    %c0_i32_2 = arith.constant 0 : i32
    return %c0_i32, %c0_i32_0, %c0_i32_1 : i32, i32, i32
  }
  func.func @transform_5(%arg0: i32) -> (i32, i32) {
    %c0_i32 = arith.constant 0 : i32
    %c0_i32_0 = arith.constant 0 : i32
    %c0_i32_1 = arith.constant 0 : i32
    return %c0_i32, %c0_i32_0 : i32, i32
  }
  func.func @transform_6(%arg0: i32) -> (i32, i32, i32) {
    %c0_i32 = arith.constant 0 : i32
    %c0_i32_0 = arith.constant 0 : i32
    %c0_i32_1 = arith.constant 0 : i32
    return %arg0, %c0_i32, %c0_i32_0 : i32, i32, i32
  }
}

</mosaic_0001>

<bundles_post_ra>
// kernel: tile.8
= control target key start
LH: loop header
LB: loop body
LE: loop exit
PB: predicated region body
PF: predicated region fallthrough
CT: control target
= control target key end

     0   :  { %s22_s0 = inlined_call_operand.vmem [shape: f32[2], index: 0, kind: input, shape index: {}]   ;;  %s23_s1 = inlined_call_operand.vmem [shape: f32[4,2], index: 1, kind: output, shape index: {}]  }
   0x1   :  { %v4_v0 = vld [vmem:[%s22_s0] ss:$0 sm:$0xff] }
   0x2   :  { %5 = vst [vmem:[%s23_s1] sm:$0xf] %v4_v0 }

// kernel: tile.0
= control target key start
LH: loop header
LB: loop body
LE: loop exit
PB: predicated region body
PF: predicated region fallthrough
CT: control target
= control target key end

     0   :  { %vm7_vm0 = vcmask 7168   ;;  %s37_s0 = inlined_call_operand.vmem [shape: f32[4,2], index: 0, kind: input, shape index: {}]   ;;  %s38_s1 = inlined_call_operand.vmem [shape: f32[8,1], index: 1, kind: output, shape index: {}]  }
   0x1   :  { %v4_v0 = vld [vmem:[%s37_s0] sm:$0xf]  ;;  %s17_s0 = smov 127  }
   0x2   :  { %5 = vst [vmem:[#allocation0] sm:$0xf] %v4_v0 }
   0x9   :  { %v9_v1 = vld [vmem:[#allocation0] sm:$0xf]  }
   0xa   :  { %v6_v2 = vld [vmem:[#allocation0] sm:$0xf]   ;;  %10 = vrot.lane.b32.xlu0 %v9_v1, %s17_s0 }
   0xb   :  { %8 = vst.msk [vmem:[%s38_s1] ss:$2 sm:$0xf] %vm7_vm0, %v6_v2  }
  0x7c   :  { %v11_v3 = vpop.permute.xlu0 %10  }
  0x7d   :  { %15 = vst.msk [vmem:[%s38_s1 + $0x1] ss:$2 sm:$0xf] %vm7_vm0, %v11_v3  }

// kernel: observation_encoder.1
= control target key start
LH: loop header
LB: loop body
LE: loop exit
PB: predicated region body
PF: predicated region fallthrough
CT: control target
= control target key end

     0   :  { %s1289_s21 = smov 0   ;;  %s1443_s0 = inlined_call_operand.vmem [shape: bf16[2,48,256], index: 0, kind: input, shape index: {}]   ;;  %s1444_s1 = inlined_call_operand.vmem [shape: bf16[4,8,48], index: 1, kind: input, shape index: {}]   ;;  %s1445_s2 = inlined_call_operand.vmem [shape: f32[8,1], index: 2, kind: input, shape index: {}]   ;;  %s1446_s3 = inlined_call_operand.vmem [shape: f32[1,144], index: 3, kind: input, shape index: {}]   ;;  %s1447_s4 = inlined_call_operand.vmem [shape: bf16[9,4,8], index: 4, kind: input, shape index: {}]   ;;  %s1448_s5 = inlined_call_operand.vmem [shape: f32[4,1], index: 5, kind: input, shape index: {}]   ;;  %s1449_s6 = inlined_call_operand.vmem [shape: f32[2,4,128], index: 6, kind: output, shape index: {}]  }
   0x1 LB: > { %s1105_s22 = sadd.s32 4294967295, %s1241_s21   ;;  %p1109_p0 = scmp.ge.s32.totalorder %s1241_s21, 1  ;;  %s1241_s21 = sphi %s1289_s21, %s16_s21  }
   0x2   : > { %p212_p1 = scmp.lt.s32.totalorder %s1241_s21, 3 }
   0x4   : > { %p213_p2 = pnand %p1109_p0, %p212_p1 }
   0x5   : > { %p241_p3 = scmp.lt.s32.totalorder (!%p213_p2), %s1105_s22, 1  ;;  %s1243_s27 = smov (!%p213_p2), 127   ;;  %v1244_v6 = vmov (!%p213_p2), 0   ;;  %vm319_vm0 = vcmask (!%p213_p2), 392192   ;;  %v251_v7 = vld [vmem:[%s1444_s1] sm:$0xf] (!%p213_p2)  ;;  %v560_v50 = vlaneseq (!%p213_p2) }
   0x6   : > { %216 = sbr.rel (%p213_p2) target bundleno = 766 (0x2fe), region = 44  ;;  %355 = vmatprep.mubr.bf16.mxu0 (!%p213_p2), %v1244_v6  ;;  %405 = vmatprep.mubr.bf16.mxu1 (!%p213_p2), %v1244_v6  ;;  %s1245_s30 = smov (!%p213_p2), 121   ;;  %v264_v8 = vld [vmem:[%s1445_s2] sm:$0xff] (!%p213_p2)  ;;  %vm309_vm1 = vcmask (!%p213_p2), 1039360   ;;  %vm426_vm2 = vcmask (!%p213_p2), 990208   ;;  %vm494_vm3 = vcmask (!%p213_p2), 982016  }
   0x7   : > { %1225 = vset.pattern.permute.xlu0 (!%p213_p2), %v1244_v6  ;;  %s1246_s7 = smov (!%p213_p2), 120   ;;  %v252_v20 = vld [vmem:[%s1444_s1 + $0x4] sm:$0xf] (!%p213_p2)  ;;  %v253_v34 = vld [vmem:[%s1444_s1 + $0x8] sm:$0xf] (!%p213_p2)  ;;  %v1247_v43 = vmov (!%p213_p2), 0.0  }
   0x8   : > { %v254_v38 = vld [vmem:[%s1444_s1 + $0xc] sm:$0xf] (!%p213_p2)  ;;  %v561_v51 = vshrl.u32 (!%p213_p2), %v560_v50, 7  ;;  %v266_v60 = vld [vmem:[%s1446_s3] sm:$0x3] (!%p213_p2)  ;;  %vm1248_vm4 = vmmov (!%p213_p2), 0  }
   0x9   : > { %vm585_vm5 = vcmask (!%p213_p2), 1043456   ;;  %s1249_s18 = smov (!%p213_p2), 126   ;;  %vm581_vm6 = vcmask (!%p213_p2), 64512   ;;  %s1251_s24 = smov (!%p213_p2), 114   ;;  %vm679_vm7 = vcmask (!%p213_p2), 1031168   ;;  %vm836_vm8 = vcmask (!%p213_p2), 973824  }
   0xa   : > { %v562_v58 = vsub.s32 (!%p213_p2), 0, %v561_v51  ;;  %s1252_s25 = smov (!%p213_p2), 113   ;;  %vm889_vm9 = vcmask (!%p213_p2), 932864   ;;  %vm942_vm10 = vcmask (!%p213_p2), 924672   ;;  %vm995_vm11 = vcmask (!%p213_p2), 916480  }
   0xd   : > { %s1451_s22 = smov (!%p241_p3, %s1105_s22), 1 }
   0xe   : > { %s1205_s23 = smul.u32 48, %s1451_s22 }
  0x10   : > { %s245_s26 = scalar_lea.vmem %s1443_s0, %s1205_s23  ;;  %s1250_s23 = smov 119  }
  0x11   : > { %v1226_v0 = vld [vmem:[%s245_s26 + $0x10] ss:$8 sps:$4 sm:$0xff]   ;;  %v1228_v1 = vld [vmem:[%s245_s26] ss:$8 sps:$4 sm:$0xff]   ;;  %v1230_v2 = vld [vmem:[%s245_s26 + $0x14] ss:$8 sps:$4 sm:$0xff]  }
  0x12   : > { %301 = vrot.lane.b32.xlu1 %v1226_v0, %s1243_s27  ;;  %v1231_v3 = vld [vmem:[%s245_s26 + $0x4] ss:$8 sps:$4 sm:$0xff]   ;;  %297 = vrot.lane.b32.xlu0 %v1228_v1, %s1243_s27  ;;  %v1234_v5 = vld [vmem:[%s245_s26 + $0x20] ss:$8 sps:$4 sm:$0xff]  }
  0x13   : > { %373 = vmatprep.subr.bf16.mxu1 %v1231_v3  ;;  %v1232_v4 = vld [vmem:[%s245_s26 + $0x24] ss:$8 sps:$4 sm:$0xff]   ;;  %s1253_s26 = smov 112  }
  0x14   : > { %374 = vmatpush1.bf16.msra.mxu1 %v1228_v1 }
  0x15   : > { %375 = vmatprep.subr.bf16.mxu1 %v1230_v2 }
  0x16   : > { %303 = vrot.lane.b32.xlu1 %v1230_v2, %s1243_s27  ;;  %299 = vrot.lane.b32.xlu0 %v1231_v3, %s1243_s27 }
  0x18   : > { %376 = vmatpush1.bf16.msra.mxu1 %v1226_v0 }
  0x19   : > { %377 = vmatprep.subr.bf16.mxu1 %v1232_v4 }
  0x1a   : > { %307 = vrot.lane.b32.xlu1 %v1232_v4, %s1243_s27  ;;  %305 = vrot.lane.b32.xlu0 %v1234_v5, %s1243_s27 }
  0x1c   : > { %378 = vmatpush1.bf16.msra.mxu1 %v1234_v5 }
  0x1e   : > { %416 = vrot.lane.b32.xlu1 %v1231_v3, %s1245_s30  ;;  %414 = vrot.lane.b32.xlu0 %v1228_v1, %s1245_s30 }
  0x1f   : > { %1119 = vmatmul.mubr.msk.bf16.vlgmr.msra.gmra.mrb[0].mxu1 %vm319_vm0, %v251_v7 }
  0x20   : > { %539 = vmatprep.mubr.bf16.mxu1 %v1244_v6 }
  0x22   : > { %484 = vrot.lane.b32.xlu1 %v1231_v3, %s1246_s7  ;;  %482 = vrot.lane.b32.xlu0 %v1228_v1, %s1246_s7  ;;  %v563_v3 = vrot.slane %v266_v60, %v562_v58 }
  0x26   : > { %420 = vrot.lane.b32.xlu1 %v1230_v2, %s1245_s30  ;;  %418 = vrot.lane.b32.xlu0 %v1226_v0, %s1245_s30 }
  0x2a   : > { %488 = vrot.lane.b32.xlu1 %v1230_v2, %s1246_s7  ;;  %486 = vrot.lane.b32.xlu0 %v1226_v0, %s1246_s7  ;;  %v566_v0 = vsub.s32 1, %v561_v51  ;;  %v261_v51 = vld [vmem:[%s1447_s4 + $0xc] sm:$0x3] }
  0x2c   : > { %v567_v7 = vrot.slane %v266_v60, %v566_v0 }
  0x2e   : > { %424 = vrot.lane.b32.xlu1 %v1232_v4, %s1245_s30  ;;  %422 = vrot.lane.b32.xlu0 %v1234_v5, %s1245_s30 }
  0x32   : > { %492 = vrot.lane.b32.xlu1 %v1232_v4, %s1246_s7  ;;  %490 = vrot.lane.b32.xlu0 %v1234_v5, %s1246_s7 }
  0x36   : > { %552 = vperm.xlu0 %1225, %v264_v8  }
  0x84   : > { %v302_v9 = vpop.permute.xlu1 %301  ;;  %v298_v10 = vpop.permute.xlu0 %297 }
  0x88   : > { %v304_v11 = vpop.permute.xlu1 %303  ;;  %v300_v12 = vpop.permute.xlu0 %299 }
  0x89   : > { %323 = vmatprep.subr.bf16.mxu0 %v300_v12  ;;  %v310_v13 = vsel %vm309_vm1, %v298_v10, %v300_v12  ;;  %v311_v16 = vsel %vm309_vm1, %v302_v9, %v304_v11 }
  0x8a   : > { %324 = vmatpush1.bf16.msra.mxu0 %v310_v13 }
  0x8b   : > { %325 = vmatprep.subr.bf16.mxu0 %v304_v11 }
  0x8c   : > { %v308_v14 = vpop.permute.xlu1 %307  ;;  %v306_v15 = vpop.permute.xlu0 %305 }
  0x8d   : > { %v312_v19 = vsel %vm309_vm1, %v306_v15, %v308_v14  ;;  %v255_v15 = vld [vmem:[%s1447_s4] sm:$0x3] }
  0x8e   : > { %326 = vmatpush1.bf16.msra.mxu0 %v311_v16  ;;  %v265_v16 = vld [vmem:[%s1448_s5] sm:$0xf] }
  0x8f   : > { %327 = vmatprep.subr.bf16.mxu0 %v308_v14 }
  0x90   : > { %v417_v17 = vpop.permute.xlu1 %416  ;;  %v415_v18 = vpop.permute.xlu0 %414 }
  0x91   : > { %v427_v23 = vsel %vm426_vm2, %v415_v18, %v417_v17 }
  0x92   : > { %328 = vmatpush1.bf16.msra.mxu0 %v312_v19 }
  0x93   : > { %439 = vmatprep.subr.bf16.mxu0 %v417_v17 }
  0x94   : > { %v485_v21 = vpop.permute.xlu1 %484  ;;  %v483_v22 = vpop.permute.xlu0 %482 }
  0x95   : > { %507 = vmatprep.subr.bf16.mxu1 %v485_v21  ;;  %v495_v24 = vsel %vm494_vm3, %v483_v22, %v485_v21  ;;  %1118 = vmatmul.mubr.msk.bf16.vlgmr.msra.gmra.mrb[0].mxu0 %vm319_vm0, %v252_v20 }
  0x96   : > { %440 = vmatpush1.bf16.msra.mxu0 %v427_v23  ;;  %508 = vmatpush1.bf16.msra.mxu1 %v495_v24  ;;  %v256_v23 = vld [vmem:[%s1447_s4 + $0x2] sm:$0x3] }
  0x97   : > { %471 = vmatprep.mubr.bf16.mxu0 %v1244_v6 }
  0x98   : > { %v421_v25 = vpop.permute.xlu1 %420  ;;  %v419_v26 = vpop.permute.xlu0 %418 }
  0x99   : > { %441 = vmatprep.subr.bf16.mxu0 %v421_v25  ;;  %v428_v27 = vsel %vm426_vm2, %v419_v26, %v421_v25 }
  0x9a   : > { %442 = vmatpush1.bf16.msra.mxu0 %v428_v27 }
  0x9c   : > { %v489_v28 = vpop.permute.xlu1 %488  ;;  %v487_v29 = vpop.permute.xlu0 %486 }
  0x9d   : > { %509 = vmatprep.subr.bf16.mxu1 %v489_v28  ;;  %v496_v30 = vsel %vm494_vm3, %v487_v29, %v489_v28 }
  0x9e   : > { %510 = vmatpush1.bf16.msra.mxu1 %v496_v30 }
  0xa0   : > { %v425_v31 = vpop.permute.xlu1 %424  ;;  %v423_v32 = vpop.permute.xlu0 %422 }
  0xa1   : > { %443 = vmatprep.subr.bf16.mxu0 %v425_v31  ;;  %v429_v33 = vsel %vm426_vm2, %v423_v32, %v425_v31  ;;  %v257_v32 = vld [vmem:[%s1447_s4 + $0x4] sm:$0x3] }
  0xa2   : > { %444 = vmatpush1.bf16.msra.mxu0 %v429_v33  ;;  %v258_v33 = vld [vmem:[%s1447_s4 + $0x6] sm:$0x3] }
  0xa3   : > { %1151 = vmatprep.subr.bf16.mxu0 %v1247_v43 }
  0xa4   : > { %v493_v35 = vpop.permute.xlu1 %492  ;;  %v491_v36 = vpop.permute.xlu0 %490 }
  0xa5   : > { %511 = vmatprep.subr.bf16.mxu1 %v493_v35  ;;  %v497_v37 = vsel %vm494_vm3, %v491_v36, %v493_v35  ;;  %1120 = vmatmul.mubr.msk.bf16.vlgmr.msra.gmra.mrb[4].mxu0 %vm319_vm0, %v253_v34 }
  0xa6   : > { %512 = vmatpush1.bf16.msra.mxu1 %v497_v37  ;;  %1153 = vmatprep.mubr.msk.bf16.mxu0 %vm1248_vm4, %v1247_v43 }
  0xa7   : > { %1157 = vmatprep.subr.bf16.mxu1 %v1247_v43 }
  0xa9   : > { %1121 = vmatmul.mubr.msk.bf16.vlgmr.msra.gmra.mrb[4].mxu1 %vm319_vm0, %v254_v38 }
  0xaa   : > { %1159 = vmatprep.mubr.msk.bf16.mxu1 %vm1248_vm4, %v1247_v43 }
  0xb5   : > { %v553_v61 = vpop.permute.xlu0 %552 }
  0xf2   : > { %v407_v39 = vpop.f32.mrb[0].mxu1 }
  0xf3   : > { %v409_v40 = vpop.f32.mrb[1].mxu1 }
  0xf4   : > { %v411_v41 = vpop.f32.mrb[2].mxu1 }
  0xf5   : > { %v412_v42 = vpop.f32.mrb[3].mxu1  ;;  %v259_v41 = vld [vmem:[%s1447_s4 + $0x8] sm:$0x3] }
  0xf6   : > { %v260_v42 = vld [vmem:[%s1447_s4 + $0xa] sm:$0x3] }
 0x168   : > { %v357_v44 = vpop.f32.mrb[0].mxu0 }
 0x169   : > { %v359_v45 = vpop.f32.mrb[1].mxu0  ;;  %v408_v46 = vadd.f32 %v407_v39, %v357_v44 }
 0x16a   : > { %v361_v47 = vpop.f32.mrb[2].mxu0  ;;  %v410_v48 = vadd.f32 %v409_v40, %v359_v45 }
 0x16b   : > { %v362_v49 = vpop.f32.mrb[3].mxu0 }
 0x178   : > { %v473_v52 = vpop.f32.mrb[4].mxu0 }
 0x179   : > { %v480_v53 = vadd.f32 %v473_v52, %v408_v46  ;;  %v475_v54 = vpop.f32.mrb[5].mxu0  ;;  %v262_v52 = vld [vmem:[%s1447_s4 + $0xe] sm:$0x3] }
 0x17a   : > { %v481_v55 = vadd.f32 %v475_v54, %v410_v48  ;;  %v477_v56 = vpop.f32.mrb[6].mxu0 }
 0x17b   : > { %v478_v57 = vpop.f32.mrb[7].mxu0 }
 0x17c   : > { %v541_v59 = vpop.f32.mrb[4].mxu1  ;;  %v263_v57 = vld [vmem:[%s1447_s4 + $0x10] sm:$0x3] }
 0x17d   : > { %v548_v62 = vadd.f32 %v541_v59, %v480_v53  ;;  %v543_v63 = vpop.f32.mrb[5].mxu1 }
 0x17e   : > { %v549_v1 = vadd.f32 %v543_v63, %v481_v55  ;;  %v545_v2 = vpop.f32.mrb[6].mxu1 }
 0x17f   : > { %v555_v4 = vadd.f32 %v553_v61, %v548_v62  ;;  %v546_v5 = vpop.f32.mrb[7].mxu1 }
 0x180   : > { %v556_v6 = vadd.f32 %v553_v61, %v549_v1 }
 0x181   : > { %v557_v8 = vmax.f32 %v555_v4, 0.0 }
 0x182   : > { %v558_v9 = vmax.f32 %v556_v6, 0.0 }
 0x183   : > { %v570_v10 = vmul.f32 %v563_v3, %v557_v8 }
 0x184   : > { %v571_v11 = vmul.f32 %v567_v7, %v558_v9 }
 0x185   : > { %v572_v12 = vpack.c.bf16 %v570_v10, %v570_v10 }
 0x186   : > { %v573_v14 = vpack.c.bf16 %v571_v11, %v571_v11 }
 0x187   : > { %675 = vrot.lane.b32.xlu0 %v572_v12, %s1249_s18  ;;  %576 = vrot.lane.b32.xlu1 %v572_v12, %s1243_s27  ;;  %v633_v13 = vsel %vm585_vm5, %v572_v12, 0 }
 0x188   : > { %1158 = vmatpush3.bf16.msra.mxu1 %v633_v13 }
 0x189   : > { %1169 = vmatprep.subr.bf16.mxu1 %v1247_v43 }
 0x18b   : > { %728 = vrot.lane.b32.xlu0 %v572_v12, %s1245_s30  ;;  %578 = vrot.lane.b32.xlu1 %v573_v14, %s1243_s27 }
 0x18c   : > { %1160 = vmatmul.mubr.msk.bf16.vlgmr.msra.gmra.mrb[8].mxu1 %vm581_vm6, %v255_v15 }
 0x18d   : > { %1171 = vmatprep.mubr.msk.bf16.mxu1 %vm1248_vm4, %v1247_v43 }
 0x18f   : > { %780 = vrot.lane.b32.xlu0 %v572_v12, %s1246_s7  ;;  %677 = vrot.lane.b32.xlu1 %v573_v14, %s1249_s18 }
 0x193   : > { %832 = vrot.lane.b32.xlu0 %v572_v12, %s1250_s23  ;;  %730 = vrot.lane.b32.xlu1 %v573_v14, %s1245_s30 }
 0x197   : > { %885 = vrot.lane.b32.xlu0 %v572_v12, %s1251_s24  ;;  %782 = vrot.lane.b32.xlu1 %v573_v14, %s1246_s7 }
 0x19b   : > { %938 = vrot.lane.b32.xlu0 %v572_v12, %s1252_s25  ;;  %834 = vrot.lane.b32.xlu1 %v573_v14, %s1250_s23  ;;  %s1111_s23 = sshll.u32 %s1451_s22, 2 }
 0x19f   : > { %991 = vrot.lane.b32.xlu0 %v572_v12, %s1253_s26  ;;  %887 = vrot.lane.b32.xlu1 %v573_v14, %s1251_s24 }
 0x1a3   : > { %1046 = vperm.xlu0 %1225, %v265_v16   ;;  %940 = vrot.lane.b32.xlu1 %v573_v14, %s1252_s25 }
 0x1a7   : > { %993 = vrot.lane.b32.xlu1 %v573_v14, %s1253_s26  ;;  %s249_s26 = scalar_lea.vmem %s1449_s6, %s1111_s23 }
 0x1f9   : > { %v676_v17 = vpop.permute.xlu0 %675  ;;  %v577_v18 = vpop.permute.xlu1 %576 }
 0x1fd   : > { %v729_v19 = vpop.permute.xlu0 %728  ;;  %v579_v20 = vpop.permute.xlu1 %578 }
 0x1fe   : > { %v580_v21 = vsel %vm309_vm1, %v577_v18, %v579_v20 }
 0x1ff   : > { %v587_v22 = vsel %vm585_vm5, %v580_v21, 0 }
 0x200   : > { %1152 = vmatpush3.bf16.msra.mxu0 %v587_v22 }
 0x201   : > { %v781_v24 = vpop.permute.xlu0 %780  ;;  %v678_v25 = vpop.permute.xlu1 %677  ;;  %1163 = vmatprep.subr.bf16.mxu0 %v1247_v43 }
 0x202   : > { %v680_v26 = vsel %vm679_vm7, %v676_v17, %v678_v25 }
 0x203   : > { %v685_v27 = vsel %vm585_vm5, %v680_v26, 0  ;;  %1154 = vmatmul.mubr.msk.bf16.vlgmr.msra.gmra.mrb[8].mxu0 %vm581_vm6, %v256_v23 }
 0x204   : > { %1164 = vmatpush3.bf16.msra.mxu0 %v685_v27  ;;  %1165 = vmatprep.mubr.msk.bf16.mxu0 %vm1248_vm4, %v1247_v43 }
 0x205   : > { %v731_v28 = vpop.permute.xlu1 %730  ;;  %1175 = vmatprep.subr.bf16.mxu0 %v1247_v43  ;;  %v833_v30 = vpop.permute.xlu0 %832 }
 0x206   : > { %v732_v29 = vsel %vm426_vm2, %v729_v19, %v731_v28 }
 0x207   : > { %v737_v31 = vsel %vm585_vm5, %v732_v29, 0 }
 0x208   : > { %1170 = vmatpush3.bf16.msra.mxu1 %v737_v31 }
 0x209   : > { %v783_v34 = vpop.permute.xlu1 %782  ;;  %1181 = vmatprep.subr.bf16.mxu1 %v1247_v43  ;;  %v886_v37 = vpop.permute.xlu0 %885 }
 0x20a   : > { %v784_v35 = vsel %vm494_vm3, %v781_v24, %v783_v34 }
 0x20b   : > { %v789_v36 = vsel %vm585_vm5, %v784_v35, 0  ;;  %1166 = vmatmul.mubr.msk.bf16.vlgmr.msra.gmra.mrb[12].mxu0 %vm581_vm6, %v257_v32  ;;  %1172 = vmatmul.mubr.msk.bf16.vlgmr.msra.gmra.mrb[12].mxu1 %vm581_vm6, %v258_v33 }
 0x20c   : > { %1176 = vmatpush3.bf16.msra.mxu0 %v789_v36  ;;  %1177 = vmatprep.mubr.msk.bf16.mxu0 %vm1248_vm4, %v1247_v43 }
 0x20d   : > { %v835_v38 = vpop.permute.xlu1 %834  ;;  %1187 = vmatprep.subr.bf16.mxu0 %v1247_v43  ;;  %1183 = vmatprep.mubr.msk.bf16.mxu1 %vm1248_vm4, %v1247_v43  ;;  %v939_v46 = vpop.permute.xlu0 %938 }
 0x20e   : > { %v837_v39 = vsel %vm836_vm8, %v833_v30, %v835_v38 }
 0x20f   : > { %v842_v40 = vsel %vm585_vm5, %v837_v39, 0 }
 0x210   : > { %1182 = vmatpush3.bf16.msra.mxu1 %v842_v40 }
 0x211   : > { %v888_v44 = vpop.permute.xlu1 %887  ;;  %1193 = vmatprep.subr.bf16.mxu1 %v1247_v43  ;;  %v992_v53 = vpop.permute.xlu0 %991 }
 0x212   : > { %v890_v45 = vsel %vm889_vm9, %v886_v37, %v888_v44 }
 0x213   : > { %v895_v47 = vsel %vm585_vm5, %v890_v45, 0  ;;  %1178 = vmatmul.mubr.msk.bf16.vlgmr.msra.gmra.mrb[16].mxu0 %vm581_vm6, %v259_v41  ;;  %1184 = vmatmul.mubr.msk.bf16.vlgmr.msra.gmra.mrb[16].mxu1 %vm581_vm6, %v260_v42 }
 0x214   : > { %1188 = vmatpush3.bf16.msra.mxu0 %v895_v47  ;;  %1189 = vmatprep.mubr.msk.bf16.mxu0 %vm1248_vm4, %v1247_v43 }
 0x215   : > { %v941_v48 = vpop.permute.xlu1 %940  ;;  %1199 = vmatprep.subr.bf16.mxu0 %v1247_v43  ;;  %1195 = vmatprep.mubr.msk.bf16.mxu1 %vm1248_vm4, %v1247_v43 }
 0x216   : > { %v943_v49 = vsel %vm942_vm10, %v939_v46, %v941_v48 }
 0x217   : > { %v948_v50 = vsel %vm585_vm5, %v943_v49, 0 }
 0x218   : > { %1194 = vmatpush3.bf16.msra.mxu1 %v948_v50 }
 0x219   : > { %v994_v54 = vpop.permute.xlu1 %993 }
 0x21a   : > { %v996_v55 = vsel %vm995_vm11, %v992_v53, %v994_v54 }
 0x21b   : > { %v1001_v56 = vsel %vm585_vm5, %v996_v55, 0  ;;  %1190 = vmatmul.mubr.msk.bf16.vlgmr.msra.gmra.mrb[20].mxu0 %vm581_vm6, %v261_v51  ;;  %1196 = vmatmul.mubr.msk.bf16.vlgmr.msra.gmra.mrb[20].mxu1 %vm581_vm6, %v262_v52 }
 0x21c   : > { %1200 = vmatpush3.bf16.msra.mxu0 %v1001_v56  ;;  %1201 = vmatprep.mubr.msk.bf16.mxu0 %vm1248_vm4, %v1247_v43 }
 0x222   : > { %v1047_v35 = vpop.permute.xlu0 %1046 }
 0x223   : > { %1202 = vmatmul.mubr.msk.bf16.vlgmr.msra.gmra.mrb[24].mxu0 %vm581_vm6, %v263_v57 }
 0x25f   : > { %v669_v58 = vpop.f32.mrb[8].mxu1 }
 0x260   : > { %v1161_v59 = vpop.f32.mrb[9].mxu1 }
 0x261   : > { %v672_v60 = vpop.f32.mrb[10].mxu1 }
 0x262   : > { %v1162_v61 = vpop.f32.mrb[11].mxu1 }
 0x2d6   : > { %v623_v62 = vpop.f32.mrb[8].mxu0 }
 0x2d7   : > { %v1155_v63 = vpop.f32.mrb[9].mxu0  ;;  %v670_v0 = vadd.f32 %v669_v58, %v623_v62 }
 0x2d8   : > { %v626_v1 = vpop.f32.mrb[10].mxu0 }
 0x2d9   : > { %v1156_v2 = vpop.f32.mrb[11].mxu0 }
 0x2de   : > { %v721_v3 = vpop.f32.mrb[12].mxu0  ;;  %v773_v4 = vpop.f32.mrb[12].mxu1 }
 0x2df   : > { %v727_v5 = vadd.f32 %v721_v3, %v670_v0  ;;  %v1167_v6 = vpop.f32.mrb[13].mxu0  ;;  %v1173_v43 = vpop.f32.mrb[13].mxu1 }
 0x2e0   : > { %v724_v7 = vpop.f32.mrb[14].mxu0  ;;  %v776_v8 = vpop.f32.mrb[14].mxu1 }
 0x2e1   : > { %v779_v9 = vadd.f32 %v773_v4, %v727_v5  ;;  %v1168_v10 = vpop.f32.mrb[15].mxu0  ;;  %v1174_v11 = vpop.f32.mrb[15].mxu1 }
 0x2e6   : > { %v825_v12 = vpop.f32.mrb[16].mxu0  ;;  %v878_v13 = vpop.f32.mrb[16].mxu1 }
 0x2e7   : > { %v831_v14 = vadd.f32 %v825_v12, %v779_v9  ;;  %v1179_v15 = vpop.f32.mrb[17].mxu0  ;;  %v1185_v16 = vpop.f32.mrb[17].mxu1 }
 0x2e8   : > { %v828_v17 = vpop.f32.mrb[18].mxu0  ;;  %v881_v18 = vpop.f32.mrb[18].mxu1 }
 0x2e9   : > { %v884_v19 = vadd.f32 %v878_v13, %v831_v14  ;;  %v1180_v20 = vpop.f32.mrb[19].mxu0  ;;  %v1186_v21 = vpop.f32.mrb[19].mxu1 }
 0x2ee   : > { %v931_v22 = vpop.f32.mrb[20].mxu0  ;;  %v984_v23 = vpop.f32.mrb[20].mxu1 }
 0x2ef   : > { %v937_v24 = vadd.f32 %v931_v22, %v884_v19  ;;  %v1191_v25 = vpop.f32.mrb[21].mxu0  ;;  %v1197_v26 = vpop.f32.mrb[21].mxu1 }
 0x2f0   : > { %v934_v27 = vpop.f32.mrb[22].mxu0  ;;  %v987_v28 = vpop.f32.mrb[22].mxu1 }
 0x2f1   : > { %v990_v29 = vadd.f32 %v984_v23, %v937_v24  ;;  %v1192_v30 = vpop.f32.mrb[23].mxu0  ;;  %v1198_v31 = vpop.f32.mrb[23].mxu1 }
 0x2f6   : > { %v1037_v32 = vpop.f32.mrb[24].mxu0 }
 0x2f7   : > { %v1043_v33 = vadd.f32 %v1037_v32, %v990_v29  ;;  %v1203_v34 = vpop.f32.mrb[25].mxu0 }
 0x2f8   : > { %v1040_v36 = vpop.f32.mrb[26].mxu0 }
 0x2f9   : > { %v1049_v37 = vadd.f32 %v1047_v35, %v1043_v33  ;;  %v1204_v38 = vpop.f32.mrb[27].mxu0 }
 0x2fb   : > { %v1050_v39 = vmax.f32 %v1049_v37, 0.0 }
 0x2fd   : > { %1051 = vst [vmem:[%s249_s26] sm:$0xf] %v1050_v39 }
 0x2fe PF: > { %s16_s21 = sadd.s32 1, %s1241_s21  }
 0x2ff   : > { %p13_p4 = scmp.ge.s32.totalorder %s16_s21, 4  }
 0x301   :  { %15 = sbr.rel (!%p13_p4) target bundleno = 1 (0x1), region = 74 }

</bundles_post_ra>
